<compile_context>
chip_gen: v7x
topology: tpu7x:2x2x1
jax: 0.10.0
libtpu: 0.0.40
codegen_flags: <defaults>
</compile_context>

<pallas_src>
import jax
import jax.numpy as jnp
from jax.experimental import pallas as pl
from jax.experimental.pallas import tpu as pltpu

BATCH_SIZE = 1
HIDDEN_SIZE = 32
INPUT_SIZE = 16
NUM_CLASSES = 2
SEQUENCE_LENGTH = 1

LANES = 4 * HIDDEN_SIZE          # 128 = exactly one vreg lane width
assert LANES == 128


def gru_fc_kernel(x_ref, h0_ref, w_ref, out_ref, h_scr):
    """One GRU step per grid iteration; FC head + stores only on the last step.

    x_ref  : (1, B, I)          timestep-t input slice (time-major)
    h0_ref : (B, H)             initial hidden state (DMA'd once)
    w_ref  : (I + 2H + 2, 128)  packed weights + biases
               rows 0:I        x-side gate weights [W_ir^T | W_iz^T | W_in^T |   0   ]
               rows I:I+H      h-side gate weights [W_hr^T | W_hz^T |   0    | W_hn^T]
               rows I+H:I+2H   FC weight W_fc^T, zero-padded to 128 lanes
               row  I+2H       fused gate bias [b_ir+b_hr | b_iz+b_hz | b_in | b_hn]
               row  I+2H+1     FC bias, zero-padded to 128 lanes
    out_ref: (2B, 128)          rows 0:B = h_new (lane-padded), rows B:2B = logits
    h_scr  : (B, H) VMEM        recurrent hidden state carried across grid steps
    """
    t = pl.program_id(0)
    T = pl.num_programs(0)
    _, B, I = x_ref.shape
    H = h0_ref.shape[-1]

    @pl.when(t == 0)
    def _():
        h_scr[...] = h0_ref[...]

    x = x_ref[0]                                     # (B, I)  f32
    h = h_scr[...]                                   # (B, H)  f32

    # Two small MXU pushes accumulating into one full 128-lane gate vector.
    g = (jnp.dot(x, w_ref[0:I, :], preferred_element_type=jnp.float32)
         + jnp.dot(h, w_ref[I:I + H, :], preferred_element_type=jnp.float32)
         + w_ref[I + 2 * H:I + 2 * H + 1, :])        # (B, 128) = [r | z | i_n | h_n]

    r = jax.nn.sigmoid(g[:, 0:H])                            # reset gate
    z = jax.nn.sigmoid(g[:, H:2 * H])                        # update gate
    n = jnp.tanh(g[:, 2 * H:3 * H] + r * g[:, 3 * H:4 * H])  # candidate state
    h_new = (1.0 - z) * n + z * h                            # (B, H)
    h_scr[...] = h_new

    @pl.when(t == T - 1)
    def _():
        # FC head; logits land on lanes 0:C of a full 128-lane row.
        logits = (jnp.dot(h_new, w_ref[I + H:I + 2 * H, :],
                          preferred_element_type=jnp.float32)
                  + w_ref[I + 2 * H + 1:I + 2 * H + 2, :])            # (B, 128)
        h_row = jnp.concatenate(
            [h_new, jnp.zeros((B, LANES - H), jnp.float32)], axis=1)  # (B, 128)
        out_ref[...] = jnp.concatenate([h_row, logits], axis=0)       # (2B, 128)


def pack_params(params):
    """One-time packing of PyTorch-layout GRU/FC params into ONE fused operand."""
    H, I, C, L = HIDDEN_SIZE, INPUT_SIZE, NUM_CLASSES, LANES
    w_ih, w_hh = params["w_ih"], params["w_hh"]      # (3H, I), (3H, H)
    b_ih, b_hh = params["b_ih"], params["b_hh"]      # (3H,), (3H,)
    w_fc, b_fc = params["w_fc"], params["b_fc"]      # (C, H), (C,)

    zI = jnp.zeros((I, H), jnp.float32)
    zH = jnp.zeros((H, H), jnp.float32)
    # PyTorch gate order r, z, n.  x-side: [r | z | n | 0]; h-side: [r | z | 0 | n].
    wx4 = jnp.concatenate(
        [w_ih[0:H].T, w_ih[H:2 * H].T, w_ih[2 * H:3 * H].T, zI], axis=1)   # (I, 128)
    wh4 = jnp.concatenate(
        [w_hh[0:H].T, w_hh[H:2 * H].T, zH, w_hh[2 * H:3 * H].T], axis=1)   # (H, 128)
    wfc_pad = jnp.zeros((H, L), jnp.float32).at[:, 0:C].set(w_fc.T)        # (H, 128)
    b4 = jnp.concatenate([b_ih[0:H] + b_hh[0:H],
                          b_ih[H:2 * H] + b_hh[H:2 * H],
                          b_ih[2 * H:3 * H],
                          b_hh[2 * H:3 * H]]).reshape(1, L)                # (1, 128)
    bfc_pad = jnp.zeros((1, L), jnp.float32).at[0, 0:C].set(b_fc)          # (1, 128)

    # Single fused slab: (I + 2H + 2, 128) = (82, 128).
    return {"w_all": jnp.concatenate([wx4, wh4, wfc_pad, b4, bfc_pad], axis=0)}


def gru_fc_forward(hidden, x, packed):
    """hidden: (1, B, H); x reshapeable to (B, T, I).  Returns (hidden', logits)."""
    B, H, I, C = BATCH_SIZE, HIDDEN_SIZE, INPUT_SIZE, NUM_CLASSES
    T = SEQUENCE_LENGTH

    # batch_first (B, T, I) -> time-major (T, B, I): wrapper-side layout plumbing
    # so the per-step x block is a clean leading-dim slice.
    x_tm = jnp.transpose(x.reshape(B, T, I), (1, 0, 2))
    h2d = hidden.reshape(B, H)

    out_fused = pl.pallas_call(
        gru_fc_kernel,
        grid=(T,),
        out_shape=jax.ShapeDtypeStruct((2 * B, LANES), jnp.float32),
        in_specs=[
            pl.BlockSpec((1, B, I), lambda t: (t, 0, 0)),              # x[t]
            pl.BlockSpec((B, H), lambda t: (0, 0)),                    # h0 (once)
            pl.BlockSpec((I + 2 * H + 2, LANES), lambda t: (0, 0)),    # weights (once)
        ],
        out_specs=pl.BlockSpec((2 * B, LANES), lambda t: (0, 0)),      # resident acc
        scratch_shapes=[pltpu.VMEM((B, H), jnp.float32)],              # hidden state
        compiler_params=pltpu.CompilerParams(
            dimension_semantics=("arbitrary",)),                       # recurrence
    )(x_tm, h2d, packed["w_all"])

    h_new = out_fused[0:B, 0:H]
    logits = out_fused[B:2 * B, 0:C]
    return h_new.reshape(1, B, H), logits


def init_params(key):
    H, I, C = HIDDEN_SIZE, INPUT_SIZE, NUM_CLASSES
    ks = jax.random.split(key, 6)
    bound = 1.0 / jnp.sqrt(H)
    u = lambda k, shape: jax.random.uniform(k, shape, jnp.float32, -bound, bound)
    return {
        "w_ih": u(ks[0], (3 * H, I)),   # PyTorch weight_ih_l0
        "w_hh": u(ks[1], (3 * H, H)),   # PyTorch weight_hh_l0
        "b_ih": u(ks[2], (3 * H,)),
        "b_hh": u(ks[3], (3 * H,)),
        "w_fc": u(ks[4], (C, H)),       # PyTorch fc.weight
        "b_fc": u(ks[5], (C,)),
    }


def gru_fc_reference(hidden, x, params):
    """Pure-JAX reference of the PyTorch module (nn.GRU + nn.Linear)."""
    H = HIDDEN_SIZE
    x3d = x.reshape(BATCH_SIZE, SEQUENCE_LENGTH, INPUT_SIZE)
    h = hidden.reshape(BATCH_SIZE, H)
    for t in range(SEQUENCE_LENGTH):
        xt = x3d[:, t, :]
        gi = xt @ params["w_ih"].T + params["b_ih"]
        gh = h @ params["w_hh"].T + params["b_hh"]
        r = jax.nn.sigmoid(gi[:, 0:H] + gh[:, 0:H])
        z = jax.nn.sigmoid(gi[:, H:2 * H] + gh[:, H:2 * H])
        n = jnp.tanh(gi[:, 2 * H:3 * H] + r * gh[:, 2 * H:3 * H])
        h = (1.0 - z) * n + z * h
    out = h @ params["w_fc"].T + params["b_fc"]
    return h.reshape(1, BATCH_SIZE, H), out


if __name__ == "__main__":
    key = jax.random.PRNGKey(0)
    k_params, k_x, k_h = jax.random.split(key, 3)

    params = init_params(k_params)
    packed = pack_params(params)          # one-time weight packing (hoisted)

    x = jax.random.normal(k_x, (BATCH_SIZE, INPUT_SIZE), jnp.float32)
    hidden0 = jax.random.normal(k_h, (1, BATCH_SIZE, HIDDEN_SIZE), jnp.float32)

    step = jax.jit(lambda h, xx: gru_fc_forward(h, xx, packed))
    hidden_new, out = step(hidden0, x)
    jax.block_until_ready((hidden_new, out))

    assert hidden_new.shape == (1, BATCH_SIZE, HIDDEN_SIZE)
    assert out.shape == (BATCH_SIZE, NUM_CLASSES)

    # Correctness check against the pure-JAX reference.
    h_ref, out_ref = gru_fc_reference(hidden0, x, params)
    assert jnp.allclose(hidden_new, h_ref, atol=1e-5, rtol=1e-5)
    assert jnp.allclose(out, out_ref, atol=1e-5, rtol=1e-5)

    print("KERNEL_OK")
</pallas_src>

<mosaic_0001>
module attributes {stable_mosaic.version = 11 : i64} {
  func.func @gru_fc_kernel(%arg0: i32, %arg1: memref<1x1x16xf32, #tpu.memory_space<vmem>>, %arg2: memref<1x32xf32, #tpu.memory_space<vmem>>, %arg3: memref<82x128xf32, #tpu.memory_space<vmem>>, %arg4: memref<2x128xf32, #tpu.memory_space<vmem>>, %arg5: memref<1x32xf32, #tpu.memory_space<vmem>>) attributes {dimension_semantics = [#tpu.dimension_semantics<arbitrary>], iteration_bounds = array<i64: 1>, scalar_prefetch = 0 : i64, scratch_operands = 1 : i64, tpu.core_type = #tpu.core_type<tc>, window_params = [{transform_indices = @transform_0, window_bounds = array<i64: 1, 1, 16>}, {pipeline_mode = #tpu.pipeline_mode<synchronous>, transform_indices = @transform_1, window_bounds = array<i64: 1, 32>}, {pipeline_mode = #tpu.pipeline_mode<synchronous>, transform_indices = @transform_2, window_bounds = array<i64: 82, 128>}, {pipeline_mode = #tpu.pipeline_mode<synchronous>, transform_indices = @transform_3, window_bounds = array<i64: 2, 128>}]} {
    %c0_i32 = arith.constant 0 : i32
    %0 = arith.cmpi eq, %arg0, %c0_i32 : i32
    %1 = arith.extui %0 : i1 to i32
    %c0_i32_0 = arith.constant 0 : i32
    %2 = arith.cmpi ne, %1, %c0_i32_0 : i32
    scf.if %2 {
      %c0_17 = arith.constant 0 : index
      %c0_18 = arith.constant 0 : index
      %39 = vector.load %arg2[%c0_17, %c0_18] : memref<1x32xf32, #tpu.memory_space<vmem>>, vector<1x32xf32>
      %c0_19 = arith.constant 0 : index
      %c0_20 = arith.constant 0 : index
      %40 = vector.load %arg5[%c0_19, %c0_20] : memref<1x32xf32, #tpu.memory_space<vmem>>, vector<1x32xf32>
      tpu.vector_store %arg5[%c0_19, %c0_20], %39 {strides = array<i32>} : memref<1x32xf32, #tpu.memory_space<vmem>>, vector<1x32xf32>,
    } else {
    }
    %c0 = arith.constant 0 : index
    %c0_1 = arith.constant 0 : index
    %c0_2 = arith.constant 0 : index
    %3 = vector.load %arg1[%c0, %c0_1, %c0_2] : memref<1x1x16xf32, #tpu.memory_space<vmem>>, vector<1x1x16xf32>
    %4 = vector.shape_cast %3 : vector<1x1x16xf32> to vector<1x16xf32>
    %c0_3 = arith.constant 0 : index
    %c0_4 = arith.constant 0 : index
    %5 = vector.load %arg5[%c0_3, %c0_4] : memref<1x32xf32, #tpu.memory_space<vmem>>, vector<1x32xf32>
    %c0_5 = arith.constant 0 : index
    %c0_6 = arith.constant 0 : index
    %6 = vector.load %arg3[%c0_5, %c0_6] : memref<82x128xf32, #tpu.memory_space<vmem>>, vector<16x128xf32>
    %cst = arith.constant dense<0.000000e+00> : vector<1x128xf32>
    %7 = tpu.matmul %4, %6, %cst {dimension_numbers = #tpu.dot_dimension_numbers<[1], [0], [0], [1], [0, 0, 1, 1], [], []>} : vector<1x16xf32>, vector<16x128xf32>, vector<1x128xf32> -> vector<1x128xf32>
    %c16 = arith.constant 16 : index
    %c0_7 = arith.constant 0 : index
    %8 = vector.load %arg3[%c16, %c0_7] : memref<82x128xf32, #tpu.memory_space<vmem>>, vector<32x128xf32>
    %cst_8 = arith.constant dense<0.000000e+00> : vector<1x128xf32>
    %9 = tpu.matmul %5, %8, %cst_8 {dimension_numbers = #tpu.dot_dimension_numbers<[1], [0], [0], [1], [0, 0, 1, 1], [], []>} : vector<1x32xf32>, vector<32x128xf32>, vector<1x128xf32> -> vector<1x128xf32>
    %10 = arith.addf %7, %9 : vector<1x128xf32>
    %c80 = arith.constant 80 : index
    %c0_9 = arith.constant 0 : index
    %11 = vector.load %arg3[%c80, %c0_9] : memref<82x128xf32, #tpu.memory_space<vmem>>, vector<1x128xf32>
    %12 = arith.addf %10, %11 : vector<1x128xf32>
    %13 = vector.extract_strided_slice %12 {offsets = [0, 0], sizes = [1, 32], strides = [1, 1]} : vector<1x128xf32> to vector<1x32xf32>
    %14 = arith.negf %13 : vector<1x32xf32>
    %15 = math.exp %14 : vector<1x32xf32>
    %cst_10 = arith.constant 1.000000e+00 : f32
    %16 = vector.broadcast %cst_10 : f32 to vector<1x32xf32>
    %17 = arith.addf %16, %15 : vector<1x32xf32>
    %18 = arith.divf %16, %17 : vector<1x32xf32>
    %19 = vector.extract_strided_slice %12 {offsets = [0, 32], sizes = [1, 32], strides = [1, 1]} : vector<1x128xf32> to vector<1x32xf32>
    %20 = arith.negf %19 : vector<1x32xf32>
    %21 = math.exp %20 : vector<1x32xf32>
    %cst_11 = arith.constant 1.000000e+00 : f32
    %22 = vector.broadcast %cst_11 : f32 to vector<1x32xf32>
    %23 = arith.addf %22, %21 : vector<1x32xf32>
    %24 = arith.divf %22, %23 : vector<1x32xf32>
    %25 = vector.extract_strided_slice %12 {offsets = [0, 64], sizes = [1, 32], strides = [1, 1]} : vector<1x128xf32> to vector<1x32xf32>
    %26 = vector.extract_strided_slice %12 {offsets = [0, 96], sizes = [1, 32], strides = [1, 1]} : vector<1x128xf32> to vector<1x32xf32>
    %27 = arith.mulf %18, %26 : vector<1x32xf32>
    %28 = arith.addf %25, %27 : vector<1x32xf32>
    %29 = math.tanh %28 : vector<1x32xf32>
    %cst_12 = arith.constant 1.000000e+00 : f32
    %30 = vector.broadcast %cst_12 : f32 to vector<1x32xf32>
    %31 = arith.subf %30, %24 : vector<1x32xf32>
    %32 = arith.mulf %31, %29 : vector<1x32xf32>
    %33 = arith.mulf %24, %5 : vector<1x32xf32>
    %34 = arith.addf %32, %33 : vector<1x32xf32>
    %c0_13 = arith.constant 0 : index
    %c0_14 = arith.constant 0 : index
    %35 = vector.load %arg5[%c0_13, %c0_14] : memref<1x32xf32, #tpu.memory_space<vmem>>, vector<1x32xf32>
    tpu.vector_store %arg5[%c0_13, %c0_14], %34 {strides = array<i32>} : memref<1x32xf32, #tpu.memory_space<vmem>>, vector<1x32xf32>,
    %c0_i32_15 = arith.constant 0 : i32
    %36 = arith.cmpi eq, %arg0, %c0_i32_15 : i32
    %37 = arith.extui %36 : i1 to i32
    %c0_i32_16 = arith.constant 0 : i32
    %38 = arith.cmpi ne, %37, %c0_i32_16 : i32
    scf.if %38 {
      %c48 = arith.constant 48 : index
      %c0_17 = arith.constant 0 : index
      %39 = vector.load %arg3[%c48, %c0_17] : memref<82x128xf32, #tpu.memory_space<vmem>>, vector<32x128xf32>
      %cst_18 = arith.constant dense<0.000000e+00> : vector<1x128xf32>
      %40 = tpu.matmul %34, %39, %cst_18 {dimension_numbers = #tpu.dot_dimension_numbers<[1], [0], [0], [1], [0, 0, 1, 1], [], []>} : vector<1x32xf32>, vector<32x128xf32>, vector<1x128xf32> -> vector<1x128xf32>
      %c81 = arith.constant 81 : index
      %c0_19 = arith.constant 0 : index
      %41 = vector.load %arg3[%c81, %c0_19] : memref<82x128xf32, #tpu.memory_space<vmem>>, vector<1x128xf32>
      %42 = arith.addf %40, %41 : vector<1x128xf32>
      %cst_20 = arith.constant 0.000000e+00 : f32
      %43 = vector.broadcast %cst_20 : f32 to vector<1x96xf32>
      %44 = tpu.concatenate %34, %43 in 1 : vector<1x32xf32>, vector<1x96xf32> -> vector<1x128xf32>
      %45 = tpu.concatenate %44, %42 in 0 : vector<1x128xf32>, vector<1x128xf32> -> vector<2x128xf32>
      %c0_21 = arith.constant 0 : index
      %c0_22 = arith.constant 0 : index
      %46 = vector.load %arg4[%c0_21, %c0_22] : memref<2x128xf32, #tpu.memory_space<vmem>>, vector<2x128xf32>
      tpu.vector_store %arg4[%c0_21, %c0_22], %45 {strides = array<i32>} : memref<2x128xf32, #tpu.memory_space<vmem>>, vector<2x128xf32>,
    } else {
    }
    return
  }
  func.func @transform_0(%arg0: i32) -> (i32, i32, i32) {
    %c0_i32 = arith.constant 0 : i32
    %c0_i32_0 = arith.constant 0 : i32
    %c0_i32_1 = arith.constant 0 : i32
    return %arg0, %c0_i32, %c0_i32_0 : i32, i32, i32
  }
  func.func @transform_1(%arg0: i32) -> (i32, i32) {
    %c0_i32 = arith.constant 0 : i32
    %c0_i32_0 = arith.constant 0 : i32
    %c0_i32_1 = arith.constant 0 : i32
    return %c0_i32, %c0_i32_0 : i32, i32
  }
  func.func @transform_2(%arg0: i32) -> (i32, i32) {
    %c0_i32 = arith.constant 0 : i32
    %c0_i32_0 = arith.constant 0 : i32
    %c0_i32_1 = arith.constant 0 : i32
    return %c0_i32, %c0_i32_0 : i32, i32
  }
  func.func @transform_3(%arg0: i32) -> (i32, i32) {
    %c0_i32 = arith.constant 0 : i32
    %c0_i32_0 = arith.constant 0 : i32
    %c0_i32_1 = arith.constant 0 : i32
    return %c0_i32, %c0_i32_0 : i32, i32
  }
}

</mosaic_0001>

<bundles_post_ra>
// kernel: _lambda_.1
= control target key start
LH: loop header
LB: loop body
LE: loop exit
PB: predicated region body
PF: predicated region fallthrough
CT: control target
= control target key end

     0   :  { %8 = vsyncpa [#allocation4], 0  ;;  %s423_s12 = smov [#allocation3]   ;;  %s488_s0 = inlined_call_operand.vmem [shape: f32[1,1,16], index: 0, kind: input, shape index: {}]   ;;  %s489_s1 = inlined_call_operand.vmem [shape: f32[1,32], index: 1, kind: input, shape index: {}]   ;;  %s490_s2 = inlined_call_operand.hbm [shape: f32[82,128], index: 2, kind: input, shape index: {}]   ;;  %s491_s3 = inlined_call_operand.vmem [shape: f32[2,128], index: 3, kind: output, shape index: {}]  }
   0x1   :  { %s18_s13 = sshll.u32 %s423_s12, 4  ;;  %s399_s16 = scalar_lea.hbm %s490_s2, 1408  ;;  %s19_s13 = int_to_ptr.vmem [resolvable:$true] %s18_s13 }
   0x2   :  { %p400_p0 = scmp.ne.s32.totalorder %s490_s2, %s399_s16  ;;  %p403_p1 = scmp.lt.u32.totalorder %s399_s16, %s490_s2 }
   0x4   :  { %p405_p2 = pnand %p403_p1, %p400_p0 }
   0x6   :  { %408 = shalt.err (!%p405_p2)
}
   0x7   :  { %s409_s21 = scalar_lea.vmem %s19_s13, 1408  ;;  %p414_p4 = scmp.lt.s32.totalorder %s19_s13, %s19_s13 }
   0x8   :  { %p410_p3 = scmp.ne.s32.totalorder %s19_s13, %s409_s21  ;;  %p415_p5 = scmp.lt.s32.totalorder %s409_s21, %s409_s21 }
   0xa   :  { %p416_p6 = por %p415_p5, %p414_p4 }
   0xc   :  { %p417_p7 = pnand %p416_p6, %p410_p3 }
   0xe   :  { %420 = shalt.err (!%p417_p7)
}
   0xf   :  { %s424_s22 = smov 128   ;;  %s425_s23 = smov 8  }
  0x10   :  { %24 = dma.hbm_to_vmem [thread:$0]  %s490_s2, 1408, %s19_s13, [#allocation4], %s424_s22, %s424_s22, %s425_s23  }
  0x11   :  { %421 = dma.done.wait [#allocation4], 1408  }
  0x12   :  { %422 = vsyncadd [#allocation4], 4294965888  ;;  %v426_v0 = vmov 0.0|0.0   ;;  %vm427_vm0 = vmmov 0   ;;  %v428_v1 = vmov 0.0   ;;  %v39_v2 = vld [vmem:[#allocation3 + $0x10] sm:$0xff]  ;;  %v216_v29 = vlaneseq }
  0x13   :  { %369 = vmatprep.subr.bf16.mxu0 %v426_v0  ;;  %375 = vmatprep.subr.bf16.mxu1 %v426_v0  ;;  %v40_v3 = vld [vmem:[#allocation3 + $0x18] sm:$0xff]  ;;  %v37_v4 = vld [vmem:[#allocation3] sm:$0xff]  ;;  %vm33_vm1 = vcmask 253952   ;;  %v38_v6 = vld [vmem:[#allocation3 + $0x8] sm:$0xff]  ;;  %vm117_vm2 = vcmask 130048   ;;  %vm43_vm3 = vcmask 261120  }
  0x14   :  { %355 = vmatprep.mubr.msk.f32.mxu1 %vm427_vm0, %v428_v1  ;;  %348 = vmatprep.mubr.msk.f32.mxu0 %vm427_vm0, %v428_v1  ;;  %v370_v5 = vpack.c.bf16 %v40_v3, %v39_v2  ;;  %v41_v7 = vld [vmem:[#allocation3 + $0x20] sm:$0xff]  ;;  %v42_v8 = vld [vmem:[#allocation3 + $0x28] sm:$0xff]  ;;  %v376_v9 = vpack.c.bf16 %v38_v6, %v37_v4  ;;  %v32_v10 = vld [vmem:[%s489_s1] sm:$0x1]  ;;  %s429_s1 = smov 32   ;;  %v217_v30 = vshrl.u32 %v216_v29, 7 }
  0x15   :  { %v373_v11 = vpack.c.bf16 %v42_v8, %v41_v7  ;;  %34 = vst.msk [vmem:[#allocation2] sm:$0x1] %vm33_vm1, %v32_v10  ;;  %v35_v12 = vld [vmem:[%s488_s0] sm:$0x1]  ;;  %v191_v17 = vld [vmem:[#allocation3 + $0x50] sm:$0x1] }
  0x16   :  { %371 = vmatpush3.bf16.msra.mxu0 %v370_v5  ;;  %377 = vmatpush3.bf16.msra.mxu1 %v376_v9  ;;  %s430_s0 = smov 64   ;;  %v234_v31 = vld [vmem:[#allocation3 + $0x30] sm:$0xff]  ;;  %v235_v32 = vld [vmem:[#allocation3 + $0x38] sm:$0xff]  ;;  %v236_v33 = vld [vmem:[#allocation3 + $0x40] sm:$0xff]  ;;  %v218_v34 = vsub.s32 0, %v217_v30  ;;  %s431_s29 = smov 96  }
  0x17   :  { %372 = vmatprep.subr.bf16.mxu0 %v426_v0  ;;  %378 = vmatprep.subr.bf16.mxu1 %v426_v0  ;;  %v379_v35 = vpack.c.bf16 %v235_v32, %v234_v31  ;;  %v237_v36 = vld [vmem:[#allocation3 + $0x48] sm:$0xff]  ;;  %v238_v47 = vld [vmem:[#allocation3 + $0x51] sm:$0x1]  ;;  %vm315_vm4 = vcmask 1040384  }
  0x18   :  { %v382_v37 = vpack.c.bf16 %v237_v36, %v236_v33 }
  0x19   :  { %356 = vmatmul.mubr.msk.f32.vlgmr.msra.gmra.mrb[0].mxu1 %vm117_vm2, %v35_v12 }
  0x1a   :  { %374 = vmatpush3.bf16.msra.mxu0 %v373_v11  ;;  %366 = vmatprep.mubr.msk.f32.mxu1 %vm427_vm0, %v428_v1 }
  0x1b   :  { %380 = vmatpush3.bf16.msra.mxu1 %v379_v35 }
  0x1c   :  { %v36_v13 = vld [vmem:[#allocation2] sm:$0x1]  ;;  %381 = vmatprep.subr.bf16.mxu1 %v426_v0 }
  0x1d   :  { %349 = vmatmul.mubr.msk.f32.vlgmr.msra.gmra.mrb[0].mxu0 %vm43_vm3, %v36_v13  ;;  %v219_v39 = vrot.slane %v36_v13, %v218_v34 }
  0x1f   :  { %383 = vmatpush3.bf16.msra.mxu1 %v382_v37 }
  0xec   :  { %v187_v14 = vpop.f32.mrb[0].mxu1 }
  0xed   :  { %v357_v15 = vpop.f32.mrb[1].mxu1 }
  0xf0   :  { %v113_v16 = vpop.f32.mrb[0].mxu0 }
  0xf1   :  { %v188_v18 = vadd.f32 %v187_v14, %v113_v16  ;;  %v350_v19 = vpop.f32.mrb[1].mxu0 }
  0xf3   :  { %v192_v20 = vadd.f32 %v191_v17, %v188_v18 }
  0xf5   :  { %200 = vrot.lane.b32.xlu0 %v192_v20, %s429_s1  ;;  %v325_v21 = vmul.f32 -1.442695, %v192_v20 }
  0xf7   :  { %393 = vpow2.f32 %v325_v21 }
 0x101   :  { %v394_v22 = vpop.eup %393 }
 0x102   :  { %v196_v23 = vadd.f32 1.0, %v394_v22 }
 0x104   :  { %395 = vrcp.f32 %v196_v23 }
 0x10e   :  { %v396_v24 = vpop.eup %395 }
 0x10f   :  { %v210_v41 = vsub.f32 1.0, %v396_v24 }
 0x167   :  { %v201_v25 = vpop.permute.xlu0 %200 }
 0x168   :  { %v203_v26 = vmul.f32 %v396_v24, %v201_v25 }
 0x16a   :  { %205 = vrot.lane.b32.xlu0 %v203_v26, %s430_s0 }
 0x1dc   :  { %v206_v27 = vpop.permute.xlu0 %205 }
 0x1dd   :  { %v208_v28 = vadd.f32 %v206_v27, %v192_v20 }
 0x1df   :  { %397 = vtanh.f32 %v208_v28 }
 0x1e9   :  { %v398_v38 = vpop.eup %397 }
 0x1ea   :  { %212 = vrot.lane.b32.xlu1 %v398_v38, %s431_s29 }
 0x1ee   :  { %220 = vrot.lane.b32.xlu1 %v219_v39, %s429_s1 }
 0x25c   :  { %v213_v40 = vpop.permute.xlu1 %212 }
 0x25d   :  { %v215_v43 = vmul.f32 %v213_v40, %v210_v41 }
 0x260   :  { %v221_v42 = vpop.permute.xlu1 %220 }
 0x261   :  { %v223_v44 = vmul.f32 %v396_v24, %v221_v42 }
 0x263   :  { %v224_v45 = vadd.f32 %v223_v44, %v215_v43 }
 0x265   :  { %226 = vrot.lane.b32.xlu0 %v224_v45, %s431_s29 }
 0x2d7   :  { %v227_v46 = vpop.permute.xlu0 %226 }
 0x2d8   :  { %230 = vst.msk [vmem:[#allocation2] sm:$0x1] %vm33_vm1, %v227_v46  ;;  %367 = vmatmul.mubr.msk.f32.vlgmr.msra.gmra.mrb[2].mxu1 %vm43_vm3, %v227_v46  ;;  %v311_v52 = vsel %vm43_vm3, %v227_v46, 0.0 }
 0x3ab   :  { %v307_v48 = vpop.f32.mrb[2].mxu1 }
 0x3ac   :  { %v308_v49 = vadd.f32 %v307_v48, %v238_v47  ;;  %v368_v50 = vpop.f32.mrb[3].mxu1 }
 0x3ae   :  { %v313_v51 = vrot.slane %v308_v49, 7 }
 0x3b0   :  { %v316_v53 = vsel %vm315_vm4, %v311_v52, %v313_v51 }
 0x3b1   :  { %317 = vst [vmem:[%s491_s3] sm:$0x3] %v316_v53 }
 0x3b2   :  { %322 = vsyncpa [#allocation4], 1 }

</bundles_post_ra>
